<compile_context>
chip_gen: v6e
topology: v6e:2x2x1
jax: 0.10.0
libtpu: 0.0.40
codegen_flags: <defaults>
</compile_context>

<pallas_src>
import math

import jax
import jax.numpy as jnp
from jax.experimental import pallas as pl
from jax.experimental.pallas import tpu as pltpu

NEGATIVE_SLOPE = 1.0 / 10.0


def _leaky_relu(x):
    return jnp.where(x > 0, x, NEGATIVE_SLOPE * x)


def _disc_kernel(x_ref, w1_ref, b1_ref, w2_ref, b2_ref, w3_ref, b3_ref, out_ref):
    # x: (tb, d_in) f32.  w1/w2 bf16 (lane-dense padded), biases f32, w3 f32 row.
    x = x_ref[...]
    h1 = jnp.dot(x.astype(jnp.bfloat16), w1_ref[...],
                 preferred_element_type=jnp.float32) + b1_ref[...]
    h1 = _leaky_relu(h1)                                           # (tb, 512) f32
    h2 = jnp.dot(h1.astype(jnp.bfloat16), w2_ref[...],
                 preferred_element_type=jnp.float32) + b2_ref[...]
    h2 = _leaky_relu(h2)                                           # (tb, 384) f32
    # Layer 3: single real output unit -> VPU multiply + lane reduce; padded
    # columns of h2 and w3 are zero so the reduce is exact.  Yields (tb, 1).
    logit = jnp.sum(h2 * w3_ref[...], axis=-1, keepdims=True) + b3_ref[...]
    # Sigmoid on the single real column only; divide stays on the EUP.
    prob = pl.reciprocal(1.0 + jnp.exp(-logit), approx=True)      # (tb, 1) f32
    # Lane-dense store: batch on the lane axis (one small XLU transpose, then an
    # unmasked full-width vst).
    out_ref[...] = jnp.transpose(prob).reshape(out_ref.shape).astype(out_ref.dtype)


def _round_up(n, m):
    return ((n + m - 1) // m) * m


def _choose_batch_tile(B, block_b):
    """Pick (tb, Bp): tb multiple of 8 (or full extent), grid has an even number of
    >=2 steps for moderate/large B so the batch axis splits across v7x's 2 TCs."""
    if B <= 16:
        return B, B                       # single full-extent block
    steps = max(2, 2 * pl.cdiv(B, 2 * block_b))   # even, >= 2
    tb = _round_up(pl.cdiv(B, steps), 8)
    Bp = _round_up(B, tb)
    return tb, Bp


def discriminator_forward(x, params, *, block_b=1024):
    """x: (B, state_dim + action_dim) f32.  params: padded kernel params."""
    B, d_in = x.shape
    w1, b1 = params["w1"], params["b1"]
    w2, b2 = params["w2"], params["b2"]
    w3, b3 = params["w3"], params["b3"]

    tb, Bp = _choose_batch_tile(B, block_b)
    if Bp != B:
        x = jnp.pad(x, ((0, Bp - B), (0, 0)))
    grid_b = Bp // tb

    flops = 2 * B * (d_in * 400 + 400 * 300 + 300 * 1)
    bytes_accessed = ((w1.size + w2.size) * 2                       # bf16 weights
                      + (w3.size + b1.size + b2.size + b3.size) * 4  # f32 vectors
                      + Bp * d_in * 4                                # input x
                      + Bp * 4)                                      # lane-dense output

    out = pl.pallas_call(
        _disc_kernel,
        out_shape=jax.ShapeDtypeStruct((grid_b, 1, tb), jnp.float32),
        grid=(grid_b,),
        in_specs=[
            pl.BlockSpec((tb, d_in), lambda i: (i, 0)),   # x: pipelined per batch tile
            pl.BlockSpec(w1.shape, lambda i: (0, 0)),     # weights/biases: constant
            pl.BlockSpec(b1.shape, lambda i: (0, 0)),     # block index -> DMA'd once,
            pl.BlockSpec(w2.shape, lambda i: (0, 0)),     # VMEM-resident across grid
            pl.BlockSpec(b2.shape, lambda i: (0, 0)),
            pl.BlockSpec(w3.shape, lambda i: (0, 0)),
            pl.BlockSpec(b3.shape, lambda i: (0, 0)),
        ],
        out_specs=pl.BlockSpec((1, 1, tb), lambda i: (i, 0, 0)),    # batch on lanes
        compiler_params=pltpu.CompilerParams(
            dimension_semantics=("parallel",)),           # shards batch across TCs (v7x)
        cost_estimate=pl.CostEstimate(
            flops=flops, transcendentals=B, bytes_accessed=bytes_accessed),
    )(x, w1, b1, w2, b2, w3, b3)

    # (grid_b, 1, tb) batch-on-lanes slab -> (B, 1)
    return out.reshape(Bp, 1)[:B]


def init_discriminator_params(key, state_dim, action_dim, hidden=(400, 300)):
    """Mimics torch.nn.Linear default init (uniform +/- 1/sqrt(fan_in)).

    Returns (ref_params, kernel_params):
      ref_params    -- f32, unpadded, [in, out] layout (ground truth for checking)
      kernel_params -- lane-dense padded (400->512, 300->384); W1/W2 bf16, biases f32,
                       W3 stored as an f32 row vector (1, 384) for the VPU reduce.
    """
    in_dim = state_dim + action_dim
    dims = [in_dim, hidden[0], hidden[1], 1]
    ref = {}
    for i in range(3):
        fan_in, fan_out = dims[i], dims[i + 1]
        bound = 1.0 / math.sqrt(fan_in)
        key, kw, kb = jax.random.split(key, 3)
        ref[f"w{i + 1}"] = jax.random.uniform(
            kw, (fan_in, fan_out), jnp.float32, minval=-bound, maxval=bound)
        ref[f"b{i + 1}"] = jax.random.uniform(
            kb, (1, fan_out), jnp.float32, minval=-bound, maxval=bound)

    h1p, h2p = _round_up(hidden[0], 128), _round_up(hidden[1], 128)
    kparams = {
        "w1": jnp.zeros((in_dim, h1p), jnp.float32)
                 .at[:, :hidden[0]].set(ref["w1"]).astype(jnp.bfloat16),
        "b1": jnp.zeros((1, h1p), jnp.float32).at[:, :hidden[0]].set(ref["b1"]),
        "w2": jnp.zeros((h1p, h2p), jnp.float32)
                 .at[:hidden[0], :hidden[1]].set(ref["w2"]).astype(jnp.bfloat16),
        "b2": jnp.zeros((1, h2p), jnp.float32).at[:, :hidden[1]].set(ref["b2"]),
        # Layer 3: single real output column stored as an f32 row vector.
        "w3": jnp.zeros((1, h2p), jnp.float32)
                 .at[:, :hidden[1]].set(ref["w3"][:, 0][None, :]),
        "b3": ref["b3"].reshape(1, 1),
    }
    return ref, kparams


def _reference_forward(x, ref_params):
    h = x @ ref_params["w1"] + ref_params["b1"]
    h = jnp.where(h > 0, h, NEGATIVE_SLOPE * h)
    h = h @ ref_params["w2"] + ref_params["b2"]
    h = jnp.where(h > 0, h, NEGATIVE_SLOPE * h)
    logit = h @ ref_params["w3"] + ref_params["b3"]
    return 1.0 / (1.0 + jnp.exp(-logit))


if __name__ == "__main__":
    # Small shapes consistent with the module: x = concat([state, action], dim=1).
    state_dim = 16
    action_dim = 4

    key = jax.random.PRNGKey(0)
    kp, ks, ka = jax.random.split(key, 3)
    ref_params, kernel_params = init_discriminator_params(kp, state_dim, action_dim)

    # bf16 matmul inputs + approx reciprocal in the kernel -> looser tolerance.
    for batch in (8, 40):   # 8: single full-extent block; 40: 2-step grid + batch pad
        ksb, kab = jax.random.split(jax.random.fold_in(key, batch))
        state = jax.random.normal(ksb, (batch, state_dim), jnp.float32)
        action = jax.random.normal(kab, (batch, action_dim), jnp.float32)
        x = jnp.concatenate([state, action], axis=1)     # (B, state_dim + action_dim)

        validity = discriminator_forward(x, kernel_params)
        jax.block_until_ready(validity)

        ref = _reference_forward(x, ref_params)
        assert validity.shape == (batch, 1), validity.shape
        max_err = float(jnp.max(jnp.abs(validity - ref)))
        assert jnp.allclose(validity, ref, atol=2e-2, rtol=2e-2), max_err

    print("KERNEL_OK")
</pallas_src>

<mosaic_0001>
module attributes {stable_mosaic.version = 11 : i64} {
  func.func @_disc_kernel(%arg0: i32, %arg1: memref<8x20xf32, #tpu.memory_space<vmem>>, %arg2: memref<20x512xbf16, #tpu.memory_space<vmem>>, %arg3: memref<1x512xf32, #tpu.memory_space<vmem>>, %arg4: memref<512x384xbf16, #tpu.memory_space<vmem>>, %arg5: memref<1x384xf32, #tpu.memory_space<vmem>>, %arg6: memref<1x384xf32, #tpu.memory_space<vmem>>, %arg7: memref<1x1xf32, #tpu.memory_space<vmem>>, %arg8: memref<1x1x8xf32, #tpu.memory_space<vmem>>) attributes {dimension_semantics = [#tpu.dimension_semantics<parallel>], iteration_bounds = array<i64: 1>, scalar_prefetch = 0 : i64, scratch_operands = 0 : i64, tpu.core_type = #tpu.core_type<tc>, window_params = [{transform_indices = @transform_0, window_bounds = array<i64: 8, 20>}, {pipeline_mode = #tpu.pipeline_mode<synchronous>, transform_indices = @transform_1, window_bounds = array<i64: 20, 512>}, {pipeline_mode = #tpu.pipeline_mode<synchronous>, transform_indices = @transform_2, window_bounds = array<i64: 1, 512>}, {pipeline_mode = #tpu.pipeline_mode<synchronous>, transform_indices = @transform_3, window_bounds = array<i64: 512, 384>}, {pipeline_mode = #tpu.pipeline_mode<synchronous>, transform_indices = @transform_4, window_bounds = array<i64: 1, 384>}, {pipeline_mode = #tpu.pipeline_mode<synchronous>, transform_indices = @transform_5, window_bounds = array<i64: 1, 384>}, {pipeline_mode = #tpu.pipeline_mode<synchronous>, transform_indices = @transform_6, window_bounds = array<i64: 1, 1>}, {transform_indices = @transform_7, window_bounds = array<i64: 1, 1, 8>}]} {
    %c0 = arith.constant 0 : index
    %c0_0 = arith.constant 0 : index
    %0 = vector.load %arg1[%c0, %c0_0] : memref<8x20xf32, #tpu.memory_space<vmem>>, vector<8x20xf32>
    %1 = arith.truncf %0 : vector<8x20xf32> to vector<8x20xbf16>
    %c0_1 = arith.constant 0 : index
    %c0_2 = arith.constant 0 : index
    %2 = vector.load %arg2[%c0_1, %c0_2] : memref<20x512xbf16, #tpu.memory_space<vmem>>, vector<20x512xbf16>
    %cst = arith.constant dense<0.000000e+00> : vector<8x512xf32>
    %3 = tpu.matmul %1, %2, %cst {dimension_numbers = #tpu.dot_dimension_numbers<[1], [0], [0], [1], [0, 0, 1, 1], [], []>} : vector<8x20xbf16>, vector<20x512xbf16>, vector<8x512xf32> -> vector<8x512xf32>
    %c0_3 = arith.constant 0 : index
    %c0_4 = arith.constant 0 : index
    %4 = vector.load %arg3[%c0_3, %c0_4] : memref<1x512xf32, #tpu.memory_space<vmem>>, vector<1x512xf32>
    %5 = vector.broadcast %4 : vector<1x512xf32> to vector<8x512xf32>
    %6 = arith.addf %3, %5 : vector<8x512xf32>
    %cst_5 = arith.constant 0.000000e+00 : f32
    %7 = vector.broadcast %cst_5 : f32 to vector<8x512xf32>
    %8 = arith.cmpf ogt, %6, %7 : vector<8x512xf32>
    %cst_6 = arith.constant 1.000000e-01 : f32
    %9 = vector.broadcast %cst_6 : f32 to vector<8x512xf32>
    %10 = arith.mulf %9, %6 : vector<8x512xf32>
    %11 = arith.select %8, %6, %10 : vector<8x512xi1>, vector<8x512xf32>
    %12 = arith.truncf %11 : vector<8x512xf32> to vector<8x512xbf16>
    %c0_7 = arith.constant 0 : index
    %c0_8 = arith.constant 0 : index
    %13 = vector.load %arg4[%c0_7, %c0_8] : memref<512x384xbf16, #tpu.memory_space<vmem>>, vector<512x384xbf16>
    %cst_9 = arith.constant dense<0.000000e+00> : vector<8x384xf32>
    %14 = tpu.matmul %12, %13, %cst_9 {dimension_numbers = #tpu.dot_dimension_numbers<[1], [0], [0], [1], [0, 0, 1, 1], [], []>} : vector<8x512xbf16>, vector<512x384xbf16>, vector<8x384xf32> -> vector<8x384xf32>
    %c0_10 = arith.constant 0 : index
    %c0_11 = arith.constant 0 : index
    %15 = vector.load %arg5[%c0_10, %c0_11] : memref<1x384xf32, #tpu.memory_space<vmem>>, vector<1x384xf32>
    %16 = vector.broadcast %15 : vector<1x384xf32> to vector<8x384xf32>
    %17 = arith.addf %14, %16 : vector<8x384xf32>
    %cst_12 = arith.constant 0.000000e+00 : f32
    %18 = vector.broadcast %cst_12 : f32 to vector<8x384xf32>
    %19 = arith.cmpf ogt, %17, %18 : vector<8x384xf32>
    %cst_13 = arith.constant 1.000000e-01 : f32
    %20 = vector.broadcast %cst_13 : f32 to vector<8x384xf32>
    %21 = arith.mulf %20, %17 : vector<8x384xf32>
    %22 = arith.select %19, %17, %21 : vector<8x384xi1>, vector<8x384xf32>
    %c0_14 = arith.constant 0 : index
    %c0_15 = arith.constant 0 : index
    %23 = vector.load %arg6[%c0_14, %c0_15] : memref<1x384xf32, #tpu.memory_space<vmem>>, vector<1x384xf32>
    %24 = vector.broadcast %23 : vector<1x384xf32> to vector<8x384xf32>
    %25 = arith.mulf %22, %24 : vector<8x384xf32>
    %cst_16 = arith.constant dense<0.000000e+00> : vector<8xf32>
    %26 = vector.multi_reduction <add>, %25, %cst_16 [1] : vector<8x384xf32> to vector<8xf32>
    %27 = vector.shape_cast %26 : vector<8xf32> to vector<8x1xf32>
    %c0_17 = arith.constant 0 : index
    %c0_18 = arith.constant 0 : index
    %28 = vector.load %arg7[%c0_17, %c0_18] : memref<1x1xf32, #tpu.memory_space<vmem>>, vector<1x1xf32>
    %29 = vector.broadcast %28 : vector<1x1xf32> to vector<8x1xf32>
    %30 = arith.addf %27, %29 : vector<8x1xf32>
    %cst_19 = arith.constant 0.000000e+00 : f32
    %31 = vector.broadcast %cst_19 : f32 to vector<8x1xf32>
    %32 = arith.subf %31, %30 : vector<8x1xf32>
    %33 = math.exp %32 : vector<8x1xf32>
    %cst_20 = arith.constant 1.000000e+00 : f32
    %34 = vector.broadcast %cst_20 : f32 to vector<8x1xf32>
    %35 = arith.addf %34, %33 : vector<8x1xf32>
    %36 = tpu.reciprocal %35 {approx = true} : vector<8x1xf32> -> vector<8x1xf32>
    %37 = tpu.transpose %36, [1, 0] : vector<8x1xf32> -> vector<1x8xf32>
    %38 = vector.shape_cast %37 : vector<1x8xf32> to vector<1x1x8xf32>
    %c0_21 = arith.constant 0 : index
    %c0_22 = arith.constant 0 : index
    %c0_23 = arith.constant 0 : index
    %39 = vector.load %arg8[%c0_21, %c0_22, %c0_23] : memref<1x1x8xf32, #tpu.memory_space<vmem>>, vector<1x1x8xf32>
    tpu.vector_store %arg8[%c0_21, %c0_22, %c0_23], %38 {strides = array<i32>} : memref<1x1x8xf32, #tpu.memory_space<vmem>>, vector<1x1x8xf32>,
    return
  }
  func.func @transform_0(%arg0: i32) -> (i32, i32) {
    %c0_i32 = arith.constant 0 : i32
    %c0_i32_0 = arith.constant 0 : i32
    return %arg0, %c0_i32 : i32, i32
  }
  func.func @transform_1(%arg0: i32) -> (i32, i32) {
    %c0_i32 = arith.constant 0 : i32
    %c0_i32_0 = arith.constant 0 : i32
    %c0_i32_1 = arith.constant 0 : i32
    return %c0_i32, %c0_i32_0 : i32, i32
  }
  func.func @transform_2(%arg0: i32) -> (i32, i32) {
    %c0_i32 = arith.constant 0 : i32
    %c0_i32_0 = arith.constant 0 : i32
    %c0_i32_1 = arith.constant 0 : i32
    return %c0_i32, %c0_i32_0 : i32, i32
  }
  func.func @transform_3(%arg0: i32) -> (i32, i32) {
    %c0_i32 = arith.constant 0 : i32
    %c0_i32_0 = arith.constant 0 : i32
    %c0_i32_1 = arith.constant 0 : i32
    return %c0_i32, %c0_i32_0 : i32, i32
  }
  func.func @transform_4(%arg0: i32) -> (i32, i32) {
    %c0_i32 = arith.constant 0 : i32
    %c0_i32_0 = arith.constant 0 : i32
    %c0_i32_1 = arith.constant 0 : i32
    return %c0_i32, %c0_i32_0 : i32, i32
  }
  func.func @transform_5(%arg0: i32) -> (i32, i32) {
    %c0_i32 = arith.constant 0 : i32
    %c0_i32_0 = arith.constant 0 : i32
    %c0_i32_1 = arith.constant 0 : i32
    return %c0_i32, %c0_i32_0 : i32, i32
  }
  func.func @transform_6(%arg0: i32) -> (i32, i32) {
    %c0_i32 = arith.constant 0 : i32
    %c0_i32_0 = arith.constant 0 : i32
    %c0_i32_1 = arith.constant 0 : i32
    return %c0_i32, %c0_i32_0 : i32, i32
  }
  func.func @transform_7(%arg0: i32) -> (i32, i32, i32) {
    %c0_i32 = arith.constant 0 : i32
    %c0_i32_0 = arith.constant 0 : i32
    %c0_i32_1 = arith.constant 0 : i32
    return %arg0, %c0_i32, %c0_i32_0 : i32, i32, i32
  }
}

</mosaic_0001>

<bundles_post_ra>
// kernel: tpu_custom_call.1
= control target key start
LH: loop header
LB: loop body
LE: loop exit
PB: predicated region body
PF: predicated region fallthrough
CT: control target
= control target key end

     0   :  { %s1646_s0 = inlined_call_operand.hbm [shape: f32[8,20], index: 0, kind: input, shape index: {}]   ;;  %s1647_s1 = inlined_call_operand.hbm [shape: bf16[20,512], index: 1, kind: input, shape index: {}]   ;;  %s1648_s2 = inlined_call_operand.vmem [shape: f32[1,512], index: 2, kind: input, shape index: {}]   ;;  %s1649_s3 = inlined_call_operand.hbm [shape: bf16[512,384], index: 3, kind: input, shape index: {}]   ;;  %s1650_s4 = inlined_call_operand.vmem [shape: f32[1,384], index: 4, kind: input, shape index: {}]   ;;  %s1651_s5 = inlined_call_operand.vmem [shape: f32[1,384], index: 5, kind: input, shape index: {}]   ;;  %s1652_s6 = inlined_call_operand.<no memory space> [shape: f32[1,1], index: 6, kind: input, shape index: {}]   ;;  %s1653_s7 = inlined_call_operand.hbm [shape: f32[1,1,8], index: 7, kind: output, shape index: {}]  }
   0x1   :  { %v12_v0 = vstv %s1652_s6 }
   0x2   :  { %13 = vst [vmem:[#allocation2] sm:$0x1] %v12_v0 }
   0x3   :  { %14 = vsyncpa [#allocation4], 0 }
   0x4   :  { %15 = vsyncpa [#allocation7], 0 }
   0x5   :  { %16 = vsyncpa [#allocation5], 0  ;;  %s1550_s26 = smov [#allocation6]  }
   0x6   :  { %s32_s27 = sshll.u32 %s1550_s26, 4  ;;  %s33_s27 = int_to_ptr.vmem [resolvable:$true] %s32_s27 }
   0x7   :  { %s1472_s28 = scalar_lea.vmem %s33_s27, 768  ;;  %p1477_p1 = scmp.lt.s32.totalorder %s33_s27, %s33_s27 }
   0x8   :  { %p1473_p0 = scmp.ne.s32.totalorder %s33_s27, %s1472_s28  ;;  %p1478_p2 = scmp.lt.s32.totalorder %s1472_s28, %s1472_s28 }
   0xa   :  { %p1479_p3 = por %p1478_p2, %p1477_p1 }
   0xc   :  { %p1480_p4 = pnand %p1479_p3, %p1473_p0 }
   0xe   :  { %1483 = shalt.err (!%p1480_p4)
}
   0xf   :  { %s1551_s29 = smov 256   ;;  %s1552_s30 = smov 16  }
  0x10   :  { %38 = dma.hbm_to_vmem [thread:$0]  %s1647_s1, 768, %s33_s27, [#allocation7], %s1551_s29, %s1551_s29, %s1552_s30  }
  0x11   :  { %s1553_s6 = smov [#allocation3]   ;;  %s1554_s11 = smov [#allocation8]  }
  0x12   :  { %s23_s10 = sshll.u32 %s1553_s6, 4  ;;  %s46_s12 = sshll.u32 %s1554_s11, 4  ;;  %s24_s10 = int_to_ptr.vmem [resolvable:$true] %s23_s10  ;;  %s47_s12 = int_to_ptr.vmem [resolvable:$true] %s46_s12 }
  0x13   :  { %s1492_s13 = scalar_lea.vmem %s24_s10, 128  ;;  %p1497_p6 = scmp.lt.s32.totalorder %s24_s10, %s24_s10 }
  0x14   :  { %p1493_p5 = scmp.ne.s32.totalorder %s24_s10, %s1492_s13  ;;  %p1498_p7 = scmp.lt.s32.totalorder %s1492_s13, %s1492_s13 }
  0x16   :  { %p1499_p8 = por %p1498_p7, %p1497_p6 }
  0x18   :  { %p1500_p9 = pnand %p1499_p8, %p1493_p5 }
  0x1a   :  { %1503 = shalt.err (!%p1500_p9)
}
  0x1b   :  { %26 = dma.hbm_to_vmem [thread:$0]  %s1646_s0, 128, %s24_s10, [#allocation4]  }
  0x1c   :  { %s1512_s16 = scalar_lea.vmem %s47_s12, 12288  ;;  %p1517_p11 = scmp.lt.s32.totalorder %s47_s12, %s47_s12 }
  0x1d   :  { %p1513_p10 = scmp.ne.s32.totalorder %s47_s12, %s1512_s16  ;;  %p1518_p12 = scmp.lt.s32.totalorder %s1512_s16, %s1512_s16 }
  0x1f   :  { %p1519_p13 = por %p1518_p12, %p1517_p11 }
  0x21   :  { %p1520_p0 = pnand %p1519_p13, %p1513_p10 }
  0x23   :  { %1523 = shalt.err (!%p1520_p0)
}
  0x24   :  { %s1555_s1 = smov 192   ;;  %s1556_s17 = smov 12  }
  0x25   :  { %52 = dma.hbm_to_vmem [thread:$0]  %s1649_s3, 12288, %s47_s12, [#allocation7], %s1555_s1, %s1555_s1, %s1556_s17  }
  0x26   :  { %1544 = dma.done.wait [#allocation4], 128  }
  0x27   :  { %1545 = vsyncadd [#allocation4], 4294967168 }
  0x28   :  { %1546 = dma.done.wait [#allocation7], 13056  }
  0x29   :  { %1547 = vsyncadd [#allocation7], 4294954240  ;;  %v1557_v1 = vmov 0   ;;  %v75_v2 = vld [vmem:[#allocation6 + $0x20] sm:$0x33]  ;;  %vm133_vm0 = vcmask 1041408  }
  0x2a   :  { %178 = vmatprep.mubr.bf16.mxu0 %v1557_v1  ;;  %219 = vmatprep.mubr.bf16.mxu1 %v1557_v1  ;;  %v76_v3 = vld [vmem:[#allocation6 + $0x28] sm:$0x33]  ;;  %v1164_v4 = vcombine.high %v75_v2, %v75_v2  ;;  %v1163_v6 = vcombine.low %v75_v2, %v75_v2  ;;  %v1326_v8 = vld [vmem:[#allocation6 + $0x4] ss:$16 sps:$4 sm:$0xff]   ;;  %v1330_v12 = vld [vmem:[#allocation6] ss:$16 sps:$4 sm:$0xff]  }
  0x2b   :  { %v1166_v5 = vcombine.high %v76_v3, %v76_v3  ;;  %v1165_v7 = vcombine.low %v76_v3, %v76_v3  ;;  %v1328_v9 = vld [vmem:[#allocation6 + $0xc] ss:$16 sps:$4 sm:$0xff]   ;;  %v1331_v13 = vld [vmem:[#allocation6 + $0x8] ss:$16 sps:$4 sm:$0xff]   ;;  %vm129_vm1 = vcmask 162816   ;;  %vm1141_vm9 = vcmask 57344  }
  0x2c   :  { %1167 = vmatprep.subr.msk.bf16.mxu0 %vm133_vm0, %v1164_v4  ;;  %v135_v10 = vsel %vm133_vm0, %v1163_v6, 0  ;;  %v69_v14 = vld [vmem:[#allocation3] sm:$0xff]  ;;  %v1340_v20 = vld [vmem:[#allocation8 + $0x94] ss:$12 sps:$4 sm:$0xff]   ;;  %v1338_v22 = vld [vmem:[#allocation8 + $0x90] ss:$12 sps:$4 sm:$0xff]  }
  0x2d   :  { %1169 = vmatprep.subr.msk.bf16.mxu1 %vm133_vm0, %v1166_v5  ;;  %v141_v11 = vsel %vm133_vm0, %v1165_v7, 0  ;;  %159 = vmatpush1.bf16.msra.mxu0 %v135_v10  ;;  %v1334_v15 = vld [vmem:[#allocation8 + $0xac] ss:$12 sps:$4 sm:$0xff]   ;;  %v70_v17 = vpack.c.bf16 %v69_v14, %v69_v14  ;;  %v1332_v18 = vld [vmem:[#allocation8 + $0xa8] ss:$12 sps:$4 sm:$0xff]  }
  0x2e   :  { %200 = vmatpush1.bf16.msra.mxu1 %v141_v11  ;;  %160 = vmatprep.subr.bf16.mxu0 %v1326_v8  ;;  %v1337_v16 = vld [vmem:[#allocation8 + $0x22c] ss:$12 sps:$4 sm:$0xff]   ;;  %v1335_v19 = vld [vmem:[#allocation8 + $0x228] ss:$12 sps:$4 sm:$0xff]   ;;  %v1341_v23 = vld [vmem:[#allocation8 + $0x210] ss:$12 sps:$4 sm:$0xff]  }
  0x2f   :  { %201 = vmatprep.subr.bf16.mxu1 %v1328_v9  ;;  %v1343_v21 = vld [vmem:[#allocation8 + $0x214] ss:$12 sps:$4 sm:$0xff]   ;;  %v1346_v24 = vld [vmem:[#allocation8 + $0x7c] ss:$12 sps:$4 sm:$0xff]   ;;  %v1344_v26 = vld [vmem:[#allocation8 + $0x78] ss:$12 sps:$4 sm:$0xff]  }
  0x30   :  { %v1349_v25 = vld [vmem:[#allocation8 + $0x1fc] ss:$12 sps:$4 sm:$0xff]   ;;  %v1347_v27 = vld [vmem:[#allocation8 + $0x1f8] ss:$12 sps:$4 sm:$0xff]   ;;  %v1350_v30 = vld [vmem:[#allocation8 + $0x60] ss:$12 sps:$4 sm:$0xff]  }
  0x31   :  { %161 = vmatpush1.bf16.msra.mxu0 %v1330_v12  ;;  %v1352_v28 = vld [vmem:[#allocation8 + $0x64] ss:$12 sps:$4 sm:$0xff]   ;;  %v1353_v31 = vld [vmem:[#allocation8 + $0x1e0] ss:$12 sps:$4 sm:$0xff]   ;;  %v1356_v34 = vld [vmem:[#allocation8 + $0x48] ss:$12 sps:$4 sm:$0xff]  }
  0x32   :  { %202 = vmatpush1.bf16.msra.mxu1 %v1331_v13  ;;  %901 = vmatprep.subr.bf16.mxu0 %v1334_v15  ;;  %v1355_v29 = vld [vmem:[#allocation8 + $0x1e4] ss:$12 sps:$4 sm:$0xff]   ;;  %v1358_v32 = vld [vmem:[#allocation8 + $0x4c] ss:$12 sps:$4 sm:$0xff]   ;;  %v1359_v35 = vld [vmem:[#allocation8 + $0x1c8] ss:$12 sps:$4 sm:$0xff]  }
  0x33   :  { %942 = vmatprep.subr.bf16.mxu1 %v1337_v16  ;;  %v1361_v33 = vld [vmem:[#allocation8 + $0x1cc] ss:$12 sps:$4 sm:$0xff]   ;;  %v1364_v36 = vld [vmem:[#allocation8 + $0x34] ss:$12 sps:$4 sm:$0xff]   ;;  %v1362_v38 = vld [vmem:[#allocation8 + $0x30] ss:$12 sps:$4 sm:$0xff]  }
  0x34   :  { %1168 = vmatmul.mubr.msk.bf16.vlgmr.msra.gmra.mxu0 %vm129_vm1, %v70_v17  ;;  %v1367_v37 = vld [vmem:[#allocation8 + $0x1b4] ss:$12 sps:$4 sm:$0xff]   ;;  %v1365_v39 = vld [vmem:[#allocation8 + $0x1b0] ss:$12 sps:$4 sm:$0xff]   ;;  %v1368_v42 = vld [vmem:[#allocation8 + $0x18] ss:$12 sps:$4 sm:$0xff]  }
  0x35   :  { %1170 = vmatmul.mubr.msk.bf16.vlgmr.msra.gmra.mxu1 %vm129_vm1, %v70_v17  ;;  %902 = vmatpush1.bf16.msra.mxu0 %v1332_v18  ;;  %v1370_v40 = vld [vmem:[#allocation8 + $0x1c] ss:$12 sps:$4 sm:$0xff]   ;;  %v1371_v43 = vld [vmem:[#allocation8 + $0x198] ss:$12 sps:$4 sm:$0xff]   ;;  %v1374_v46 = vld [vmem:[#allocation8] ss:$12 sps:$4 sm:$0xff]   ;;  %v79_v18 = vlaneseq }
  0x36   :  { %943 = vmatpush1.bf16.msra.mxu1 %v1335_v19  ;;  %903 = vmatprep.subr.bf16.mxu0 %v1340_v20  ;;  %v1373_v41 = vld [vmem:[#allocation8 + $0x19c] ss:$12 sps:$4 sm:$0xff]   ;;  %v1376_v44 = vld [vmem:[#allocation8 + $0x4] ss:$12 sps:$4 sm:$0xff]   ;;  %v1377_v47 = vld [vmem:[#allocation8 + $0x180] ss:$12 sps:$4 sm:$0xff]  }
  0x37   :  { %944 = vmatprep.subr.bf16.mxu1 %v1343_v21  ;;  %v1379_v45 = vld [vmem:[#allocation8 + $0x184] ss:$12 sps:$4 sm:$0xff]   ;;  %v1382_v48 = vld [vmem:[#allocation8 + $0x16c] ss:$12 sps:$4 sm:$0xff]   ;;  %v1380_v50 = vld [vmem:[#allocation8 + $0x168] ss:$12 sps:$4 sm:$0xff]  }
  0x38   :  { %v1385_v49 = vld [vmem:[#allocation8 + $0x2ec] ss:$12 sps:$4 sm:$0xff]   ;;  %v1383_v51 = vld [vmem:[#allocation8 + $0x2e8] ss:$12 sps:$4 sm:$0xff]   ;;  %v1386_v54 = vld [vmem:[#allocation8 + $0x150] ss:$12 sps:$4 sm:$0xff]  }
  0x39   :  { %904 = vmatpush1.bf16.msra.mxu0 %v1338_v22  ;;  %v1388_v52 = vld [vmem:[#allocation8 + $0x154] ss:$12 sps:$4 sm:$0xff]   ;;  %v1389_v55 = vld [vmem:[#allocation8 + $0x2d0] ss:$12 sps:$4 sm:$0xff]   ;;  %v1392_v58 = vld [vmem:[#allocation8 + $0x138] ss:$12 sps:$4 sm:$0xff]  }
  0x3a   :  { %945 = vmatpush1.bf16.msra.mxu1 %v1341_v23  ;;  %905 = vmatprep.subr.bf16.mxu0 %v1346_v24  ;;  %v1391_v53 = vld [vmem:[#allocation8 + $0x2d4] ss:$12 sps:$4 sm:$0xff]   ;;  %v1394_v56 = vld [vmem:[#allocation8 + $0x13c] ss:$12 sps:$4 sm:$0xff]   ;;  %v1395_v59 = vld [vmem:[#allocation8 + $0x2b8] ss:$12 sps:$4 sm:$0xff]  }
  0x3b   :  { %946 = vmatprep.subr.bf16.mxu1 %v1349_v25  ;;  %v1397_v57 = vld [vmem:[#allocation8 + $0x2bc] ss:$12 sps:$4 sm:$0xff]   ;;  %v1400_v60 = vld [vmem:[#allocation8 + $0x124] ss:$12 sps:$4 sm:$0xff]   ;;  %v1398_v62 = vld [vmem:[#allocation8 + $0x120] ss:$12 sps:$4 sm:$0xff]  }
  0x3c   :  { %v1403_v61 = vld [vmem:[#allocation8 + $0x2a4] ss:$12 sps:$4 sm:$0xff]   ;;  %v1401_v63 = vld [vmem:[#allocation8 + $0x2a0] ss:$12 sps:$4 sm:$0xff]   ;;  %v1404_v2 = vld [vmem:[#allocation8 + $0x108] ss:$12 sps:$4 sm:$0xff]  }
  0x3d   :  { %906 = vmatpush1.bf16.msra.mxu0 %v1344_v26  ;;  %v1406_v0 = vld [vmem:[#allocation8 + $0x10c] ss:$12 sps:$4 sm:$0xff]   ;;  %v1407_v3 = vld [vmem:[#allocation8 + $0x288] ss:$12 sps:$4 sm:$0xff]   ;;  %v1410_v6 = vld [vmem:[#allocation8 + $0xf0] ss:$12 sps:$4 sm:$0xff]  }
  0x3e   :  { %947 = vmatpush1.bf16.msra.mxu1 %v1347_v27  ;;  %907 = vmatprep.subr.bf16.mxu0 %v1352_v28  ;;  %v1409_v1 = vld [vmem:[#allocation8 + $0x28c] ss:$12 sps:$4 sm:$0xff]   ;;  %v1412_v4 = vld [vmem:[#allocation8 + $0xf4] ss:$12 sps:$4 sm:$0xff]   ;;  %v1413_v7 = vld [vmem:[#allocation8 + $0x270] ss:$12 sps:$4 sm:$0xff]  }
  0x3f   :  { %948 = vmatprep.subr.bf16.mxu1 %v1355_v29  ;;  %v1415_v5 = vld [vmem:[#allocation8 + $0x274] ss:$12 sps:$4 sm:$0xff]   ;;  %v1418_v8 = vld [vmem:[#allocation8 + $0xdc] ss:$12 sps:$4 sm:$0xff]   ;;  %v1416_v10 = vld [vmem:[#allocation8 + $0xd8] ss:$12 sps:$4 sm:$0xff]  }
  0x40   :  { %v1421_v9 = vld [vmem:[#allocation8 + $0x25c] ss:$12 sps:$4 sm:$0xff]   ;;  %v1419_v11 = vld [vmem:[#allocation8 + $0x258] ss:$12 sps:$4 sm:$0xff]   ;;  %v1422_v14 = vld [vmem:[#allocation8 + $0xc0] ss:$12 sps:$4 sm:$0xff]  }
  0x41   :  { %908 = vmatpush1.bf16.msra.mxu0 %v1350_v30  ;;  %v1424_v12 = vld [vmem:[#allocation8 + $0xc4] ss:$12 sps:$4 sm:$0xff]   ;;  %v1425_v15 = vld [vmem:[#allocation8 + $0x240] ss:$12 sps:$4 sm:$0xff]   ;;  %v80_v19 = vshrl.u32 %v79_v18, 7 }
  0x42   :  { %949 = vmatpush1.bf16.msra.mxu1 %v1353_v31  ;;  %909 = vmatprep.subr.bf16.mxu0 %v1358_v32  ;;  %v1427_v13 = vld [vmem:[#allocation8 + $0x244] ss:$12 sps:$4 sm:$0xff]   ;;  %v1459_v18 = vld [vmem:[#allocation8 + $0x188] ss:$12 sps:$4 sm:$0xff]  }
  0x43   :  { %950 = vmatprep.subr.bf16.mxu1 %v1361_v33  ;;  %v1428_v16 = vld [vmem:[#allocation8 + $0x170] ss:$12 sps:$4 sm:$0xff]   ;;  %v1611_v20 = vsub.s32 0, %v80_v19  ;;  %v1613_v21 = vsub.s32 2, %v80_v19  ;;  %v77_v22 = vld [vmem:[%s1648_s2] sm:$0xf] }
  0x44   :  { %v1429_v17 = vld [vmem:[#allocation8 + $0x2f0] ss:$12 sps:$4 sm:$0xff]   ;;  %v1618_v23 = vsub.s32 1, %v80_v19  ;;  %v93_v24 = vsub.s32 3, %v80_v19 }
  0x45   :  { %910 = vmatpush1.bf16.msra.mxu0 %v1356_v34  ;;  %v82_v25 = vrot.slane %v77_v22, %v1611_v20  ;;  %v90_v26 = vrot.slane %v77_v22, %v1613_v21 }
  0x46   :  { %951 = vmatpush1.bf16.msra.mxu1 %v1359_v35  ;;  %911 = vmatprep.subr.bf16.mxu0 %v1364_v36  ;;  %v86_v29 = vrot.slane %v77_v22, %v1618_v23  ;;  %v94_v30 = vrot.slane %v77_v22, %v93_v24 }
  0x47   :  { %952 = vmatprep.subr.bf16.mxu1 %v1367_v37 }
  0x49   :  { %912 = vmatpush1.bf16.msra.mxu0 %v1362_v38 }
  0x4a   :  { %953 = vmatpush1.bf16.msra.mxu1 %v1365_v39  ;;  %913 = vmatprep.subr.bf16.mxu0 %v1370_v40 }
  0x4b   :  { %954 = vmatprep.subr.bf16.mxu1 %v1373_v41 }
  0x4d   :  { %914 = vmatpush1.bf16.msra.mxu0 %v1368_v42 }
  0x4e   :  { %955 = vmatpush1.bf16.msra.mxu1 %v1371_v43  ;;  %915 = vmatprep.subr.bf16.mxu0 %v1376_v44 }
  0x4f   :  { %956 = vmatprep.subr.bf16.mxu1 %v1379_v45 }
  0x51   :  { %916 = vmatpush1.bf16.msra.mxu0 %v1374_v46 }
  0x52   :  { %957 = vmatpush1.bf16.msra.mxu1 %v1377_v47  ;;  %917 = vmatprep.subr.bf16.mxu0 %v1382_v48 }
  0x53   :  { %958 = vmatprep.subr.bf16.mxu1 %v1385_v49 }
  0x55   :  { %918 = vmatpush2.bf16.msra.mxu0 %v1380_v50  ;;  %v1430_v50 = vld [vmem:[#allocation8 + $0xb0] ss:$12 sps:$4 sm:$0xff]  }
  0x56   :  { %959 = vmatpush2.bf16.msra.mxu1 %v1383_v51  ;;  %919 = vmatprep.subr.bf16.mxu0 %v1388_v52 }
  0x57   :  { %960 = vmatprep.subr.bf16.mxu1 %v1391_v53  ;;  %v1431_v53 = vld [vmem:[#allocation8 + $0x230] ss:$12 sps:$4 sm:$0xff]  }
  0x59   :  { %920 = vmatpush2.bf16.msra.mxu0 %v1386_v54 }
  0x5a   :  { %961 = vmatpush2.bf16.msra.mxu1 %v1389_v55  ;;  %921 = vmatprep.subr.bf16.mxu0 %v1394_v56  ;;  %v1432_v55 = vld [vmem:[#allocation8 + $0x158] ss:$12 sps:$4 sm:$0xff]  }
  0x5b   :  { %962 = vmatprep.subr.bf16.mxu1 %v1397_v57  ;;  %v1433_v56 = vld [vmem:[#allocation8 + $0x2d8] ss:$12 sps:$4 sm:$0xff]  }
  0x5c   :  { %v1434_v57 = vld [vmem:[#allocation8 + $0x98] ss:$12 sps:$4 sm:$0xff]  }
  0x5d   :  { %922 = vmatpush2.bf16.msra.mxu0 %v1392_v58  ;;  %v1435_v58 = vld [vmem:[#allocation8 + $0x218] ss:$12 sps:$4 sm:$0xff]  }
  0x5e   :  { %963 = vmatpush2.bf16.msra.mxu1 %v1395_v59  ;;  %923 = vmatprep.subr.bf16.mxu0 %v1400_v60  ;;  %v1436_v59 = vld [vmem:[#allocation8 + $0x140] ss:$12 sps:$4 sm:$0xff]  }
  0x5f   :  { %964 = vmatprep.subr.bf16.mxu1 %v1403_v61  ;;  %v1437_v60 = vld [vmem:[#allocation8 + $0x2c0] ss:$12 sps:$4 sm:$0xff]  }
  0x60   :  { %v1438_v61 = vld [vmem:[#allocation8 + $0x80] ss:$12 sps:$4 sm:$0xff]  }
  0x61   :  { %924 = vmatpush2.bf16.msra.mxu0 %v1398_v62  ;;  %v1439_v62 = vld [vmem:[#allocation8 + $0x200] ss:$12 sps:$4 sm:$0xff]  }
  0x62   :  { %965 = vmatpush2.bf16.msra.mxu1 %v1401_v63  ;;  %925 = vmatprep.subr.bf16.mxu0 %v1406_v0  ;;  %v1440_v63 = vld [vmem:[#allocation8 + $0x128] ss:$12 sps:$4 sm:$0xff]  }
  0x63   :  { %966 = vmatprep.subr.bf16.mxu1 %v1409_v1  ;;  %v1441_v0 = vld [vmem:[#allocation8 + $0x2a8] ss:$12 sps:$4 sm:$0xff]  }
  0x64   :  { %v1442_v1 = vld [vmem:[#allocation8 + $0x68] ss:$12 sps:$4 sm:$0xff]  }
  0x65   :  { %926 = vmatpush2.bf16.msra.mxu0 %v1404_v2  ;;  %v1443_v2 = vld [vmem:[#allocation8 + $0x1e8] ss:$12 sps:$4 sm:$0xff]  }
  0x66   :  { %967 = vmatpush2.bf16.msra.mxu1 %v1407_v3  ;;  %927 = vmatprep.subr.bf16.mxu0 %v1412_v4  ;;  %v1444_v3 = vld [vmem:[#allocation8 + $0x110] ss:$12 sps:$4 sm:$0xff]  }
  0x67   :  { %968 = vmatprep.subr.bf16.mxu1 %v1415_v5  ;;  %v1445_v4 = vld [vmem:[#allocation8 + $0x290] ss:$12 sps:$4 sm:$0xff]  }
  0x68   :  { %v1446_v5 = vld [vmem:[#allocation8 + $0x50] ss:$12 sps:$4 sm:$0xff]  }
  0x69   :  { %928 = vmatpush2.bf16.msra.mxu0 %v1410_v6  ;;  %v1447_v6 = vld [vmem:[#allocation8 + $0x1d0] ss:$12 sps:$4 sm:$0xff]  }
  0x6a   :  { %969 = vmatpush2.bf16.msra.mxu1 %v1413_v7  ;;  %929 = vmatprep.subr.bf16.mxu0 %v1418_v8  ;;  %v1448_v7 = vld [vmem:[#allocation8 + $0xf8] ss:$12 sps:$4 sm:$0xff]  }
  0x6b   :  { %970 = vmatprep.subr.bf16.mxu1 %v1421_v9  ;;  %v1449_v8 = vld [vmem:[#allocation8 + $0x278] ss:$12 sps:$4 sm:$0xff]  }
  0x6c   :  { %v1450_v9 = vld [vmem:[#allocation8 + $0x38] ss:$12 sps:$4 sm:$0xff]  }
  0x6d   :  { %930 = vmatpush2.bf16.msra.mxu0 %v1416_v10  ;;  %v1451_v10 = vld [vmem:[#allocation8 + $0x1b8] ss:$12 sps:$4 sm:$0xff]  }
  0x6e   :  { %971 = vmatpush2.bf16.msra.mxu1 %v1419_v11  ;;  %931 = vmatprep.subr.bf16.mxu0 %v1424_v12  ;;  %v1452_v11 = vld [vmem:[#allocation8 + $0xe0] ss:$12 sps:$4 sm:$0xff]  }
  0x6f   :  { %972 = vmatprep.subr.bf16.mxu1 %v1427_v13  ;;  %v1453_v12 = vld [vmem:[#allocation8 + $0x260] ss:$12 sps:$4 sm:$0xff]  }
  0x70   :  { %v1454_v13 = vld [vmem:[#allocation8 + $0x20] ss:$12 sps:$4 sm:$0xff]  }
  0x71   :  { %932 = vmatpush2.bf16.msra.mxu0 %v1422_v14  ;;  %v1455_v14 = vld [vmem:[#allocation8 + $0x1a0] ss:$12 sps:$4 sm:$0xff]  }
  0x72   :  { %973 = vmatpush2.bf16.msra.mxu1 %v1425_v15  ;;  %1268 = vmatprep.subr.bf16.mxu0 %v1428_v16  ;;  %v1456_v15 = vld [vmem:[#allocation8 + $0xc8] ss:$12 sps:$4 sm:$0xff]  }
  0x73   :  { %1290 = vmatprep.subr.bf16.mxu1 %v1429_v17  ;;  %v1457_v16 = vld [vmem:[#allocation8 + $0x248] ss:$12 sps:$4 sm:$0xff]  }
  0x74   :  { %v1458_v17 = vld [vmem:[#allocation8 + $0x8] ss:$12 sps:$4 sm:$0xff]  }
  0xf4   :  { %v180_v27 = vpop.f32.mrf.mxu0 }
  0xf5   :  { %v221_v28 = vpop.f32.mrf.mxu1  ;;  %v181_v31 = vadd.f32 %v180_v27, %v82_v25 }
  0xf6   :  { %v222_v32 = vadd.f32 %v221_v28, %v90_v26  ;;  %v182_v33 = vpop.f32.mrf.mxu0 }
  0xf7   :  { %v223_v34 = vpop.f32.mrf.mxu1  ;;  %v232_v35 = vmul.f32 0.1, %v181_v31  ;;  %vm228_vm2 = vcmp.gt.f32.partialorder %v181_v31, 0.0  ;;  %v183_v37 = vadd.f32 %v182_v33, %v86_v29 }
  0xf8   :  { %v234_v36 = vmul.f32 0.1, %v222_v32  ;;  %v224_v38 = vadd.f32 %v223_v34, %v94_v30  ;;  %v184_v39 = vpop.f32.mrf.mxu0  ;;  %vm230_vm3 = vcmp.gt.f32.partialorder %v222_v32, 0.0  ;;  %v372_v30 = vld [vmem:[%s1650_s4] sm:$0x7] }
  0xf9   :  { %v225_v40 = vpop.f32.mrf.mxu1  ;;  %vm229_vm4 = vcmp.gt.f32.partialorder %v183_v37, 0.0  ;;  %v233_v41 = vmul.f32 0.1, %v183_v37  ;;  %v236_v44 = vsel %vm228_vm2, %v181_v31, %v232_v35  ;;  %v381_v31 = vrot.slane %v372_v30, %v1618_v23 }
  0xfa   :  { %v185_v42 = vpop.f32.mrf.mxu0  ;;  %vm231_vm5 = vcmp.gt.f32.partialorder %v224_v38, 0.0  ;;  %v235_v45 = vmul.f32 0.1, %v224_v38  ;;  %v238_v46 = vsel %vm230_vm3, %v222_v32, %v234_v36  ;;  %v1623_v51 = vpack.c.bf16 %v236_v44, %v236_v44 }
  0xfb   :  { %v226_v43 = vpop.f32.mrf.mxu1  ;;  %v237_v47 = vsel %vm229_vm4, %v183_v37, %v233_v41  ;;  %v1625_v54 = vpack.c.bf16 %v238_v46, %v238_v46  ;;  %v377_v32 = vrot.slane %v372_v30, %v1611_v20  ;;  %v385_v40 = vrot.slane %v372_v30, %v1613_v21 }
  0xfc   :  { %v241_v48 = vpack.c.bf16 %v237_v47, %v237_v47  ;;  %v239_v49 = vsel %vm231_vm5, %v224_v38, %v235_v45  ;;  %v1072_v45 = vld [vmem:[%s1651_s5] sm:$0x7]  ;;  %s1558_s5 = smov [#allocation9]  }
  0xfd   :  { %v243_v52 = vpack.c.bf16 %v239_v49, %v239_v49  ;;  %v1081_v47 = vrot.slane %v1072_v45, %v1618_v23  ;;  %s1149_s22 = sshll.u32 %s1558_s5, 4  ;;  %s1150_s22 = int_to_ptr.vmem [resolvable:$true] %s1149_s22 }
  0xfe   :  { %933 = vmatprep.mubr.bf16.mxu0 %v241_v48  ;;  %s1524_s23 = scalar_lea.vmem %s1150_s22, 16  ;;  %s1528_s24 = scalar_lea.vmem %s1150_s22, 32 }
  0xff   :  { %974 = vmatprep.mubr.bf16.mxu1 %v243_v52  ;;  %934 = vmatmul.mubr.bf16.vlgmr.msra.gmra.mxu0 %v1623_v51  ;;  %p1525_p1 = scmp.ne.s32.totalorder %s1150_s22, %s1524_s23  ;;  %p1529_p2 = scmp.lt.s32.totalorder %s1150_s22, %s1150_s22 }
 0x100   :  { %975 = vmatmul.mubr.bf16.vlgmr.msra.gmra.mxu1 %v1625_v54  ;;  %1269 = vmatpush3.bf16.msra.mxu0 %v1430_v50  ;;  %p1530_p3 = scmp.lt.s32.totalorder %s1528_s24, %s1524_s23 }
 0x101   :  { %1291 = vmatpush3.bf16.msra.mxu1 %v1431_v53  ;;  %1015 = vmatprep.mubr.bf16.mxu0 %v241_v48  ;;  %v1077_v53 = vrot.slane %v1072_v45, %v1611_v20 }
 0x102   :  { %1055 = vmatprep.mubr.bf16.mxu1 %v243_v52  ;;  %1270 = vmatprep.subr.bf16.mxu0 %v1432_v55  ;;  %p1531_p4 = por %p1530_p3, %p1529_p2 }
 0x103   :  { %1292 = vmatprep.subr.bf16.mxu1 %v1433_v56 }
 0x104   :  { %1271 = vmatpush3.bf16.msra.mxu0 %v1434_v57  ;;  %v1085_v57 = vrot.slane %v1072_v45, %v1613_v21  ;;  %p1532_p5 = pnand %p1531_p4, %p1525_p1 }
 0x105   :  { %1293 = vmatpush3.bf16.msra.mxu1 %v1435_v58  ;;  %1272 = vmatprep.subr.bf16.mxu0 %v1436_v59 }
 0x106   :  { %1294 = vmatprep.subr.bf16.mxu1 %v1437_v60 }
 0x108   :  { %1273 = vmatpush3.bf16.msra.mxu0 %v1438_v61 }
 0x109   :  { %1295 = vmatpush3.bf16.msra.mxu1 %v1439_v62  ;;  %1274 = vmatprep.subr.bf16.mxu0 %v1440_v63 }
 0x10a   :  { %1296 = vmatprep.subr.bf16.mxu1 %v1441_v0  ;;  %v1267_v0 = vld [vmem:[#allocation2] ss:$0 sm:$0xff] }
 0x10c   :  { %1275 = vmatpush3.bf16.msra.mxu0 %v1442_v1 }
 0x10d   :  { %1297 = vmatpush3.bf16.msra.mxu1 %v1443_v2  ;;  %1276 = vmatprep.subr.bf16.mxu0 %v1444_v3 }
 0x10e   :  { %1298 = vmatprep.subr.bf16.mxu1 %v1445_v4 }
 0x110   :  { %1277 = vmatpush3.bf16.msra.mxu0 %v1446_v5 }
 0x111   :  { %1299 = vmatpush3.bf16.msra.mxu1 %v1447_v6  ;;  %1278 = vmatprep.subr.bf16.mxu0 %v1448_v7 }
 0x112   :  { %1300 = vmatprep.subr.bf16.mxu1 %v1449_v8 }
 0x114   :  { %1279 = vmatpush3.bf16.msra.mxu0 %v1450_v9 }
 0x115   :  { %1301 = vmatpush3.bf16.msra.mxu1 %v1451_v10  ;;  %1280 = vmatprep.subr.bf16.mxu0 %v1452_v11 }
 0x116   :  { %1302 = vmatprep.subr.bf16.mxu1 %v1453_v12 }
 0x118   :  { %1281 = vmatpush3.bf16.msra.mxu0 %v1454_v13 }
 0x119   :  { %1303 = vmatpush3.bf16.msra.mxu1 %v1455_v14  ;;  %1282 = vmatprep.subr.bf16.mxu0 %v1456_v15 }
 0x11a   :  { %1304 = vmatprep.subr.bf16.mxu1 %v1457_v16 }
 0x11c   :  { %1283 = vmatpush3.bf16.msra.mxu0 %v1458_v17 }
 0x11d   :  { %1305 = vmatpush3.bf16.msra.mxu1 %v1459_v18 }
 0x11f   :  { %1016 = vmatmul.mubr.bf16.vlgmr.msra.gmra.mxu0 %v1623_v51 }
 0x120   :  { %1056 = vmatmul.mubr.bf16.vlgmr.msra.gmra.mxu1 %v1625_v54 }
 0x1bf   :  { %v935_v19 = vpop.f32.mrf.mxu0 }
 0x1c0   :  { %v976_v22 = vpop.f32.mrf.mxu1  ;;  %v936_v34 = vadd.f32 %v935_v19, %v377_v32 }
 0x1c1   :  { %v937_v24 = vpop.f32.mrf.mxu0 }
 0x1c2   :  { %v978_v25 = vpop.f32.mrf.mxu1  ;;  %v938_v33 = vadd.f32 %v937_v24, %v381_v31  ;;  %v977_v36 = vadd.f32 %v976_v22, %v936_v34 }
 0x1c3   :  { %v939_v26 = vpop.f32.mrf.mxu0 }
 0x1c4   :  { %v980_v27 = vpop.f32.mrf.mxu1  ;;  %v979_v35 = vadd.f32 %v978_v25, %v938_v33  ;;  %v1066_v42 = vmul.f32 0.1, %v977_v36  ;;  %vm1063_vm7 = vcmp.gt.f32.partialorder %v977_v36, 0.0 }
 0x1c5   :  { %v940_v28 = vpop.f32.mrf.mxu0 }
 0x1c6   :  { %v981_v29 = vpop.f32.mrf.mxu1  ;;  %v1067_v38 = vmul.f32 0.1, %v979_v35  ;;  %vm1064_vm6 = vcmp.gt.f32.partialorder %v979_v35, 0.0  ;;  %v1069_v56 = vsel %vm1063_vm7, %v977_v36, %v1066_v42 }
 0x1c7   :  { %v1089_v60 = vmul.f32 %v1077_v53, %v1069_v56 }
 0x1c8   :  { %v1070_v51 = vsel %vm1064_vm6, %v979_v35, %v1067_v38 }
 0x1c9   :  { %v1090_v58 = vmul.f32 %v1081_v47, %v1070_v51 }
 0x1cb   :  { %v1092_v63 = vadd.f32 %v1090_v58, %v1089_v60 }
 0x1df   :  { %v1284_v37 = vpop.f32.mrf.mxu0 }
 0x1e0   :  { %v1306_v39 = vpop.f32.mrf.mxu1 }
 0x1e1   :  { %v1285_v41 = vpop.f32.mrf.mxu0 }
 0x1e2   :  { %v1286_v43 = vadd.f32 %v1285_v41, %v1284_v37  ;;  %v1307_v44 = vpop.f32.mrf.mxu1 }
 0x1e3   :  { %v1287_v46 = vpop.f32.mrf.mxu0  ;;  %v1308_v49 = vadd.f32 %v1307_v44, %v1306_v39 }
 0x1e4   :  { %v1018_v48 = vadd.f32 %v1286_v43, %v385_v40  ;;  %v1309_v50 = vpop.f32.mrf.mxu1 }
 0x1e5   :  { %v1288_v52 = vpop.f32.mrf.mxu0 }
 0x1e6   :  { %v1058_v54 = vadd.f32 %v1308_v49, %v1018_v48  ;;  %v1310_v55 = vpop.f32.mrf.mxu1 }
 0x1e8   :  { %v1068_v59 = vmul.f32 0.1, %v1058_v54  ;;  %vm1065_vm8 = vcmp.gt.f32.partialorder %v1058_v54, 0.0 }
 0x1ea   :  { %v1071_v61 = vsel %vm1065_vm8, %v1058_v54, %v1068_v59 }
 0x1eb   :  { %v1091_v62 = vmul.f32 %v1085_v57, %v1071_v61 }
 0x1ed   :  { %v1093_v23 = vadd.f32 %v1092_v63, %v1091_v62 }
 0x1ef   :  { %1094 = vadd.xlane.f32.xlu0 %v1093_v23 }
 0x278   :  { %v1095_v1 = vpop.xlane.xlu0 %1094 }
 0x279   :  { %v1103_v2 = vadd.f32 %v1267_v0, %v1095_v1 }
 0x27b   :  { %v1104_v3 = vsub.f32 0.0, %v1103_v2 }
 0x27d   :  { %v1105_v4 = vmul.f32 1.442695, %v1104_v3 }
 0x27f   :  { %1460 = vpow2.f32 %v1105_v4 }
 0x28c   :  { %v1461_v20 = vpop.eup %1460 }
 0x28d   :  { %v1107_v5 = vadd.f32 1.0, %v1461_v20 }
 0x28f   :  { %1462 = vrcp.f32 %v1107_v5 }
 0x29c   :  { %v1463_v6 = vpop.eup %1462 }
 0x29d   :  { %1109 = vxpose.xlu0.b32.start.end [1/1] (short) (narrow) %v1463_v6, 8 }
 0x319   :  { %v1125_v21 = vpop.trf.xlu0 }
 0x31a   :  { %1142 = vst.msk [vmem:[#allocation9] sm:$0x1] %vm1141_vm9, %v1125_v21 }
 0x31b   :  { %1535 = shalt.err (!%p1532_p5)
}
 0x31c   :  { %1152 = dma.vmem_to_hbm [thread:$0]  %s1150_s22, 16, %s1653_s7, [#allocation5]  }
 0x31d   :  { %1548 = dma.done.wait [#allocation5], 16  }
 0x31e   :  { %1549 = vsyncadd [#allocation5], 4294967280 }
 0x31f   :  { %1156 = vsyncpa [#allocation4], 1 }
 0x320   :  { %1157 = vsyncpa [#allocation7], 1 }
 0x321   :  { %1158 = vsyncpa [#allocation5], 1 }

</bundles_post_ra>
